<compile_context>
chip_gen: v6e
topology: v6e:2x2x1
jax: 0.10.0
libtpu: 0.0.40
codegen_flags: <defaults>
</compile_context>

<pallas_src>
import math
import functools

import jax
import jax.numpy as jnp
from jax.experimental import pallas as pl
from jax.experimental.pallas import tpu as pltpu


def _layernorm(v, g, b, eps=1e-5):
    mu = jnp.mean(v, axis=-1, keepdims=True)
    var = jnp.mean((v - mu) ** 2, axis=-1, keepdims=True)
    return (v - mu) * jax.lax.rsqrt(var + eps) * g + b


def _kv_kernel(n_head, d_k,
               x_ref, gx_ref, bx_ref, wkv_ref, bkv_ref,
               kh_ref, vh_ref):
    """Per (batch, kv_tile): K/V projection from LayerNorm(x), stored head-major in bf16."""
    bf16 = jnp.bfloat16
    f32 = jnp.float32
    D = n_head * d_k

    x_t = x_ref[...]                                            # (Tk, D) f32
    Tk = x_t.shape[0]

    x_ln = _layernorm(x_t, gx_ref[...], bx_ref[...])            # f32
    x_ln_bf = x_ln.astype(bf16)

    # Fused K/V projection: one MXU pass over x_ln, (D, 2D) weights.
    kv = jnp.dot(x_ln_bf, wkv_ref[...], preferred_element_type=f32) + bkv_ref[...]
    k = kv[:, :D]
    v = kv[:, D:]

    kh_ref[...] = jnp.transpose(k.reshape(Tk, n_head, d_k), (1, 0, 2)).astype(bf16)
    vh_ref[...] = jnp.transpose(v.reshape(Tk, n_head, d_k), (1, 0, 2)).astype(bf16)


def _block_kernel(n_head, d_k,
                  x_ref, y_ref, kh_ref, vh_ref,
                  gy_ref, by_ref,
                  wq_ref, bq_ref,
                  g2_ref, b2_ref,
                  w1_ref, b1_ref, w2_ref, b2p_ref,
                  o_ref):
    """Per (batch, query_tile): Q projection, attention against precomputed Kh/Vh, MLP, residuals."""
    bf16 = jnp.bfloat16
    f32 = jnp.float32

    x_res = x_ref[...]                                          # (TS, D) residual-stream tile
    y_t = y_ref[...]                                            # (TS, D) query source tile
    kh = kh_ref[...]                                            # (H, S, d_k) bf16
    vh = vh_ref[...]                                            # (H, S, d_k) bf16
    TS = x_res.shape[0]

    # Query projection (LayerNorm + bf16 matmul with f32 accumulation).
    y_ln = _layernorm(y_t, gy_ref[...], by_ref[...])
    q = jnp.dot(y_ln.astype(bf16), wq_ref[...], preferred_element_type=f32) + bq_ref[...]
    # Fold 1/sqrt(d_k) into q (cheaper than scaling the (H, TS, S) score tensor).
    q = q * (1.0 / math.sqrt(d_k))
    qh = jnp.transpose(q.reshape(TS, n_head, d_k), (1, 0, 2)).astype(bf16)   # (H, TS, d_k)

    # Scores: batched dot_general contracting on d_k (no explicit K transpose).
    s = jnp.einsum('hqd,hkd->hqk', qh, kh, preferred_element_type=f32)       # (H, TS, S)
    s = s - jnp.max(s, axis=-1, keepdims=True)
    p = jnp.exp(s)
    p = p * pl.reciprocal(jnp.sum(p, axis=-1, keepdims=True), approx=True)

    o = jnp.einsum('hqk,hkd->hqd', p.astype(bf16), vh, preferred_element_type=f32)
    attn = jnp.transpose(o, (1, 0, 2)).reshape(TS, n_head * d_k)             # (TS, D)

    # First residual.
    x1 = x_res + attn

    # MLP branch (QuickGELU in f32; matmuls bf16 with f32 accumulation).
    x2_ln = _layernorm(x1, g2_ref[...], b2_ref[...])
    h1 = jnp.dot(x2_ln.astype(bf16), w1_ref[...], preferred_element_type=f32) + b1_ref[...]
    h1 = h1 * jax.nn.sigmoid(1.702 * h1)
    m = jnp.dot(h1.astype(bf16), w2_ref[...], preferred_element_type=f32) + b2p_ref[...]

    # Second residual.
    o_ref[...] = (x1 + m).astype(o_ref.dtype)


def residual_cross_attention_block(x, y, params, *, n_head, seq_tile=None):
    B, S, D = x.shape
    assert D % n_head == 0, "d_model must be divisible by n_head"
    d_k = D // n_head
    Dh = params["w1"].shape[1]

    bf16 = jnp.bfloat16
    # Pre-cast matmul weights to bf16 (halves HBM traffic and resident VMEM); biases and
    # LayerNorm parameters stay f32 (applied in f32 after the f32-accumulated matmuls).
    wq = params["wq"].astype(bf16)
    wkv = jnp.concatenate([params["wk"], params["wv"]], axis=1).astype(bf16)   # (D, 2D)
    bkv = jnp.concatenate([params["bk"], params["bv"]], axis=1)                # (1, 2D) f32
    w1 = params["w1"].astype(bf16)
    w2 = params["w2"].astype(bf16)

    # ---- Chip-dependent VMEM budget. ----
    try:
        info = pltpu.get_tpu_info()
        phys_vmem = int(getattr(info, "vmem_capacity_bytes", 128 * 1024 * 1024))
    except Exception:  # pragma: no cover - conservative fallback
        phys_vmem = 128 * 1024 * 1024
    vmem_tight = phys_vmem <= 96 * 1024 * 1024          # v7x-like: 64 MiB per TensorCore
    vmem_cap = (52 if vmem_tight else 100) * 1024 * 1024
    n_bufs = 1 if vmem_tight else 2                     # Buffered(1) on tight chips

    def per_step_vmem(ts):
        # Resident bf16 weights (Wq, W1, W2) and the full-sequence bf16 Kh/Vh.
        wbytes = 2 * (D * D + 2 * D * Dh)
        kvbytes = 2 * 2 * S * D
        # Pipelined per-tile IO: x, y inputs and the output tile (f32, double-buffered).
        iobytes = 2 * (3 * ts * D * 4)
        # f32 intermediates (y_ln, q, attn, x1, x2_ln, residual adds), scores + exp + bf16 p,
        # MLP hidden f32 + bf16.
        act = 4 * (7 * ts * D + 3 * n_head * ts * S + 2 * ts * Dh) \
            + 2 * (ts * Dh + n_head * ts * S)
        return n_bufs * (wbytes + kvbytes) + iobytes + act

    # ---- Sequence tile for the query / residual / output stream. ----
    if seq_tile is None:
        if S <= 128:
            seq_tile = S
        elif S % 256 == 0 and per_step_vmem(256) <= vmem_cap:
            seq_tile = 256       # fills the 256-wide v6e/v7x MXU
        else:
            seq_tile = 128
    assert S % seq_tile == 0, "S must be divisible by the sequence tile"
    n_seq = S // seq_tile
    kv_tile = seq_tile

    vmem_main = int(min(vmem_cap, max(32 * 1024 * 1024, 1.15 * per_step_vmem(seq_tile))))
    kv_step = n_bufs * (2 * 2 * D * D) + 2 * (kv_tile * D * 4 + 2 * kv_tile * D * 2) \
        + 4 * (3 * kv_tile * D) + 2 * (2 * kv_tile * D)
    vmem_kv = int(min(vmem_cap, max(32 * 1024 * 1024, 1.15 * kv_step)))

    # ---- BlockSpec helpers (constant-index specs single-buffered on VMEM-tight chips). ----
    def const_spec(shape):
        idx = lambda b, s: (0,) * len(shape)
        if vmem_tight:
            try:
                return pl.BlockSpec(shape, idx, pipeline_mode=pl.Buffered(1))
            except TypeError:   # older jax without pipeline_mode kwarg
                pass
        return pl.BlockSpec(shape, idx)

    def kv_full_spec():
        shape = (None, n_head, S, d_k)
        idx = lambda b, s: (b, 0, 0, 0)          # changes only at batch boundaries
        if vmem_tight:
            try:
                return pl.BlockSpec(shape, idx, pipeline_mode=pl.Buffered(1))
            except TypeError:
                pass
        return pl.BlockSpec(shape, idx)

    # ---- Prologue: K/V projection, once per batch row. ----
    kh, vh = pl.pallas_call(
        functools.partial(_kv_kernel, n_head, d_k),
        out_shape=(jax.ShapeDtypeStruct((B, n_head, S, d_k), bf16),
                   jax.ShapeDtypeStruct((B, n_head, S, d_k), bf16)),
        grid=(B, S // kv_tile),
        in_specs=[
            pl.BlockSpec((None, kv_tile, D), lambda b, s: (b, s, 0)),   # x
            const_spec((1, D)), const_spec((1, D)),                     # ln_x1 gamma / beta
            const_spec((D, 2 * D)), const_spec((1, 2 * D)),             # fused Wkv, bkv
        ],
        out_specs=[
            pl.BlockSpec((None, n_head, kv_tile, d_k), lambda b, s: (b, 0, s, 0)),
            pl.BlockSpec((None, n_head, kv_tile, d_k), lambda b, s: (b, 0, s, 0)),
        ],
        compiler_params=pltpu.CompilerParams(
            dimension_semantics=("parallel", "parallel"),
            vmem_limit_bytes=vmem_kv),
    )(x, params["g_x1"], params["b_x1"], wkv, bkv)

    # ---- Main block kernel. ----
    tile_spec = pl.BlockSpec((None, seq_tile, D), lambda b, s: (b, s, 0))

    in_specs = [
        tile_spec,                                # x residual-stream tile
        tile_spec,                                # y query-source tile
        kv_full_spec(),                           # Kh (full sequence, bf16)
        kv_full_spec(),                           # Vh (full sequence, bf16)
        const_spec((1, D)), const_spec((1, D)),   # ln_y1 gamma / beta
        const_spec((D, D)), const_spec((1, D)),   # Wq, bq
        const_spec((1, D)), const_spec((1, D)),   # ln_2 gamma / beta
        const_spec((D, Dh)), const_spec((1, Dh)),  # c_fc
        const_spec((Dh, D)), const_spec((1, D)),  # c_proj
    ]

    return pl.pallas_call(
        functools.partial(_block_kernel, n_head, d_k),
        out_shape=jax.ShapeDtypeStruct((B, S, D), jnp.float32),
        grid=(B, n_seq),
        in_specs=in_specs,
        out_specs=tile_spec,
        compiler_params=pltpu.CompilerParams(
            dimension_semantics=("parallel", "parallel"),
            vmem_limit_bytes=vmem_main),
    )(x, y, kh, vh,
      params["g_y1"], params["b_y1"],
      wq, params["bq"],
      params["g_2"], params["b_2"],
      w1, params["b1"], w2, params["b2"])


def _reference(x, y, p, *, n_head):
    B, S, D = x.shape
    d_k = D // n_head
    x_ln = _layernorm(x, p["g_x1"][0], p["b_x1"][0])
    y_ln = _layernorm(y, p["g_y1"][0], p["b_y1"][0])
    q = y_ln @ p["wq"] + p["bq"][0]
    k = x_ln @ p["wk"] + p["bk"][0]
    v = x_ln @ p["wv"] + p["bv"][0]
    q = q.reshape(B, S, n_head, d_k).transpose(0, 2, 1, 3)
    k = k.reshape(B, S, n_head, d_k).transpose(0, 2, 1, 3)
    v = v.reshape(B, S, n_head, d_k).transpose(0, 2, 1, 3)
    s = jnp.einsum("bhqd,bhkd->bhqk", q, k) / math.sqrt(d_k)
    a = jax.nn.softmax(s, axis=-1)
    o = jnp.einsum("bhqk,bhkd->bhqd", a, v).transpose(0, 2, 1, 3).reshape(B, S, D)
    x1 = x + o
    x2 = _layernorm(x1, p["g_2"][0], p["b_2"][0])
    h1 = x2 @ p["w1"] + p["b1"][0]
    h1 = h1 * jax.nn.sigmoid(1.702 * h1)
    return x1 + h1 @ p["w2"] + p["b2"][0]


def make_params(key, d_model, n_head, mlp_ratio=4):
    d_hidden = d_model * mlp_ratio
    ks = jax.random.split(key, 8)
    f32 = jnp.float32

    def lin(k, fan_in, fan_out):
        kw, kb = jax.random.split(k)
        bound = 1.0 / math.sqrt(fan_in)
        w = jax.random.uniform(kw, (fan_in, fan_out), f32, -bound, bound)
        b = jax.random.uniform(kb, (1, fan_out), f32, -bound, bound)
        return w, b

    wq, bq = lin(ks[0], d_model, d_model)
    wk, bk = lin(ks[1], d_model, d_model)
    wv, bv = lin(ks[2], d_model, d_model)
    w1, b1 = lin(ks[3], d_model, d_hidden)
    w2, b2 = lin(ks[4], d_hidden, d_model)
    return dict(
        g_x1=jnp.ones((1, d_model), f32), b_x1=jnp.zeros((1, d_model), f32),
        g_y1=jnp.ones((1, d_model), f32), b_y1=jnp.zeros((1, d_model), f32),
        g_2=jnp.ones((1, d_model), f32), b_2=jnp.zeros((1, d_model), f32),
        wq=wq, bq=bq, wk=wk, bk=bk, wv=wv, bv=bv,
        w1=w1, b1=b1, w2=w2, b2=b2,
    )


if __name__ == "__main__":
    # Small but TPU-native shapes: D is a multiple of 128 (d_k == 128 per head) and S is a
    # multiple of 8, so every block satisfies the (8, 128) tiling constraint.
    B, S, d_model, n_head = 2, 8, 256, 2

    key = jax.random.PRNGKey(0)
    kx, ky, kp = jax.random.split(key, 3)
    x = jax.random.normal(kx, (B, S, d_model), jnp.float32)
    y = jax.random.normal(ky, (B, S, d_model), jnp.float32)
    params = make_params(kp, d_model, n_head)

    out = residual_cross_attention_block(x, y, params, n_head=n_head)
    out = jax.block_until_ready(out)

    ref = _reference(x, y, params, n_head=n_head)
    assert out.shape == (B, S, d_model)
    # bf16 matmul operands (f32 accumulation) + approx softmax reciprocal => loosened tolerance
    # vs the pure-f32 reference (documented, inference-oriented precision choice).
    assert jnp.allclose(out, ref, atol=5e-2, rtol=5e-2), "mismatch vs reference"
    print("KERNEL_OK")
</pallas_src>

<mosaic_0001>
module attributes {stable_mosaic.version = 11 : i64} {
  func.func @_kv_kernel(%arg0: i32, %arg1: i32, %arg2: memref<1x8x256xf32, #tpu.memory_space<vmem>>, %arg3: memref<1x256xf32, #tpu.memory_space<vmem>>, %arg4: memref<1x256xf32, #tpu.memory_space<vmem>>, %arg5: memref<256x512xbf16, #tpu.memory_space<vmem>>, %arg6: memref<1x512xf32, #tpu.memory_space<vmem>>, %arg7: memref<1x2x8x128xbf16, #tpu.memory_space<vmem>>, %arg8: memref<1x2x8x128xbf16, #tpu.memory_space<vmem>>) attributes {dimension_semantics = [#tpu.dimension_semantics<parallel>, #tpu.dimension_semantics<parallel>], iteration_bounds = array<i64: 2, 1>, scalar_prefetch = 0 : i64, scratch_operands = 0 : i64, tpu.core_type = #tpu.core_type<tc>, window_params = [{transform_indices = @transform_0, window_bounds = array<i64: 1, 8, 256>}, {pipeline_mode = #tpu.pipeline_mode<synchronous>, transform_indices = @transform_1, window_bounds = array<i64: 1, 256>}, {pipeline_mode = #tpu.pipeline_mode<synchronous>, transform_indices = @transform_2, window_bounds = array<i64: 1, 256>}, {pipeline_mode = #tpu.pipeline_mode<synchronous>, transform_indices = @transform_3, window_bounds = array<i64: 256, 512>}, {pipeline_mode = #tpu.pipeline_mode<synchronous>, transform_indices = @transform_4, window_bounds = array<i64: 1, 512>}, {transform_indices = @transform_5, window_bounds = array<i64: 1, 2, 8, 128>}, {transform_indices = @transform_6, window_bounds = array<i64: 1, 2, 8, 128>}]} {
    %c0 = arith.constant 0 : index
    %c0_0 = arith.constant 0 : index
    %c0_1 = arith.constant 0 : index
    %0 = vector.load %arg2[%c0, %c0_0, %c0_1] : memref<1x8x256xf32, #tpu.memory_space<vmem>>, vector<1x8x256xf32>
    %1 = vector.shape_cast %0 : vector<1x8x256xf32> to vector<8x256xf32>
    %c0_2 = arith.constant 0 : index
    %c0_3 = arith.constant 0 : index
    %2 = vector.load %arg3[%c0_2, %c0_3] : memref<1x256xf32, #tpu.memory_space<vmem>>, vector<1x256xf32>
    %c0_4 = arith.constant 0 : index
    %c0_5 = arith.constant 0 : index
    %3 = vector.load %arg4[%c0_4, %c0_5] : memref<1x256xf32, #tpu.memory_space<vmem>>, vector<1x256xf32>
    %cst = arith.constant dense<0.000000e+00> : vector<8xf32>
    %4 = vector.multi_reduction <add>, %1, %cst [1] : vector<8x256xf32> to vector<8xf32>
    %5 = vector.shape_cast %4 : vector<8xf32> to vector<8x1xf32>
    %cst_6 = arith.constant 2.560000e+02 : f32
    %6 = vector.broadcast %cst_6 : f32 to vector<8x1xf32>
    %7 = arith.divf %5, %6 : vector<8x1xf32>
    %8 = vector.broadcast %7 : vector<8x1xf32> to vector<8x256xf32>
    %9 = arith.subf %1, %8 : vector<8x256xf32>
    %10 = arith.mulf %9, %9 : vector<8x256xf32>
    %cst_7 = arith.constant dense<0.000000e+00> : vector<8xf32>
    %11 = vector.multi_reduction <add>, %10, %cst_7 [1] : vector<8x256xf32> to vector<8xf32>
    %12 = vector.shape_cast %11 : vector<8xf32> to vector<8x1xf32>
    %cst_8 = arith.constant 2.560000e+02 : f32
    %13 = vector.broadcast %cst_8 : f32 to vector<8x1xf32>
    %14 = arith.divf %12, %13 : vector<8x1xf32>
    %15 = vector.broadcast %7 : vector<8x1xf32> to vector<8x256xf32>
    %16 = arith.subf %1, %15 : vector<8x256xf32>
    %cst_9 = arith.constant 9.99999974E-6 : f32
    %17 = vector.broadcast %cst_9 : f32 to vector<8x1xf32>
    %18 = arith.addf %14, %17 : vector<8x1xf32>
    %19 = math.rsqrt %18 : vector<8x1xf32>
    %20 = vector.broadcast %19 : vector<8x1xf32> to vector<8x256xf32>
    %21 = arith.mulf %16, %20 : vector<8x256xf32>
    %22 = vector.broadcast %2 : vector<1x256xf32> to vector<8x256xf32>
    %23 = arith.mulf %21, %22 : vector<8x256xf32>
    %24 = vector.broadcast %3 : vector<1x256xf32> to vector<8x256xf32>
    %25 = arith.addf %23, %24 : vector<8x256xf32>
    %26 = arith.truncf %25 : vector<8x256xf32> to vector<8x256xbf16>
    %c0_10 = arith.constant 0 : index
    %c0_11 = arith.constant 0 : index
    %27 = vector.load %arg5[%c0_10, %c0_11] : memref<256x512xbf16, #tpu.memory_space<vmem>>, vector<256x512xbf16>
    %cst_12 = arith.constant dense<0.000000e+00> : vector<8x512xf32>
    %28 = tpu.matmul %26, %27, %cst_12 {dimension_numbers = #tpu.dot_dimension_numbers<[1], [0], [0], [1], [0, 0, 1, 1], [], []>} : vector<8x256xbf16>, vector<256x512xbf16>, vector<8x512xf32> -> vector<8x512xf32>
    %c0_13 = arith.constant 0 : index
    %c0_14 = arith.constant 0 : index
    %29 = vector.load %arg6[%c0_13, %c0_14] : memref<1x512xf32, #tpu.memory_space<vmem>>, vector<1x512xf32>
    %30 = vector.broadcast %29 : vector<1x512xf32> to vector<8x512xf32>
    %31 = arith.addf %28, %30 : vector<8x512xf32>
    %32 = vector.extract_strided_slice %31 {offsets = [0, 0], sizes = [8, 256], strides = [1, 1]} : vector<8x512xf32> to vector<8x256xf32>
    %33 = vector.extract_strided_slice %31 {offsets = [0, 256], sizes = [8, 256], strides = [1, 1]} : vector<8x512xf32> to vector<8x256xf32>
    %34 = vector.shape_cast %32 : vector<8x256xf32> to vector<8x2x128xf32>
    %35 = tpu.transpose %34, [1, 0, 2] : vector<8x2x128xf32> -> vector<2x8x128xf32>
    %36 = arith.truncf %35 : vector<2x8x128xf32> to vector<2x8x128xbf16>
    %c0_15 = arith.constant 0 : index
    %c0_16 = arith.constant 0 : index
    %c0_17 = arith.constant 0 : index
    %c0_18 = arith.constant 0 : index
    %37 = vector.load %arg7[%c0_15, %c0_16, %c0_17, %c0_18] : memref<1x2x8x128xbf16, #tpu.memory_space<vmem>>, vector<1x2x8x128xbf16>
    %38 = vector.shape_cast %37 : vector<1x2x8x128xbf16> to vector<2x8x128xbf16>
    %39 = vector.shape_cast %36 : vector<2x8x128xbf16> to vector<1x2x8x128xbf16>
    tpu.vector_store %arg7[%c0_15, %c0_16, %c0_17, %c0_18], %39 {strides = array<i32>} : memref<1x2x8x128xbf16, #tpu.memory_space<vmem>>, vector<1x2x8x128xbf16>,
    %40 = vector.shape_cast %33 : vector<8x256xf32> to vector<8x2x128xf32>
    %41 = tpu.transpose %40, [1, 0, 2] : vector<8x2x128xf32> -> vector<2x8x128xf32>
    %42 = arith.truncf %41 : vector<2x8x128xf32> to vector<2x8x128xbf16>
    %c0_19 = arith.constant 0 : index
    %c0_20 = arith.constant 0 : index
    %c0_21 = arith.constant 0 : index
    %c0_22 = arith.constant 0 : index
    %43 = vector.load %arg8[%c0_19, %c0_20, %c0_21, %c0_22] : memref<1x2x8x128xbf16, #tpu.memory_space<vmem>>, vector<1x2x8x128xbf16>
    %44 = vector.shape_cast %43 : vector<1x2x8x128xbf16> to vector<2x8x128xbf16>
    %45 = vector.shape_cast %42 : vector<2x8x128xbf16> to vector<1x2x8x128xbf16>
    tpu.vector_store %arg8[%c0_19, %c0_20, %c0_21, %c0_22], %45 {strides = array<i32>} : memref<1x2x8x128xbf16, #tpu.memory_space<vmem>>, vector<1x2x8x128xbf16>,
    return
  }
  func.func @transform_0(%arg0: i32, %arg1: i32) -> (i32, i32, i32) {
    %c0_i32 = arith.constant 0 : i32
    %c0_i32_0 = arith.constant 0 : i32
    return %arg0, %arg1, %c0_i32 : i32, i32, i32
  }
  func.func @transform_1(%arg0: i32, %arg1: i32) -> (i32, i32) {
    %c0_i32 = arith.constant 0 : i32
    %c0_i32_0 = arith.constant 0 : i32
    %c0_i32_1 = arith.constant 0 : i32
    return %c0_i32, %c0_i32_0 : i32, i32
  }
  func.func @transform_2(%arg0: i32, %arg1: i32) -> (i32, i32) {
    %c0_i32 = arith.constant 0 : i32
    %c0_i32_0 = arith.constant 0 : i32
    %c0_i32_1 = arith.constant 0 : i32
    return %c0_i32, %c0_i32_0 : i32, i32
  }
  func.func @transform_3(%arg0: i32, %arg1: i32) -> (i32, i32) {
    %c0_i32 = arith.constant 0 : i32
    %c0_i32_0 = arith.constant 0 : i32
    %c0_i32_1 = arith.constant 0 : i32
    return %c0_i32, %c0_i32_0 : i32, i32
  }
  func.func @transform_4(%arg0: i32, %arg1: i32) -> (i32, i32) {
    %c0_i32 = arith.constant 0 : i32
    %c0_i32_0 = arith.constant 0 : i32
    %c0_i32_1 = arith.constant 0 : i32
    return %c0_i32, %c0_i32_0 : i32, i32
  }
  func.func @transform_5(%arg0: i32, %arg1: i32) -> (i32, i32, i32, i32) {
    %c0_i32 = arith.constant 0 : i32
    %c0_i32_0 = arith.constant 0 : i32
    %c0_i32_1 = arith.constant 0 : i32
    return %arg0, %c0_i32, %arg1, %c0_i32_0 : i32, i32, i32, i32
  }
  func.func @transform_6(%arg0: i32, %arg1: i32) -> (i32, i32, i32, i32) {
    %c0_i32 = arith.constant 0 : i32
    %c0_i32_0 = arith.constant 0 : i32
    %c0_i32_1 = arith.constant 0 : i32
    return %arg0, %c0_i32, %arg1, %c0_i32_0 : i32, i32, i32, i32
  }
}

</mosaic_0001>

<bundles_post_ra>
// kernel: tpu_custom_call.1
= control target key start
LH: loop header
LB: loop body
LE: loop exit
PB: predicated region body
PF: predicated region fallthrough
CT: control target
= control target key end

     0   :  { %s2070_s0 = inlined_call_operand.hbm [shape: f32[2,8,256], index: 0, kind: input, shape index: {}]   ;;  %s2071_s1 = inlined_call_operand.hbm [shape: f32[1,256], index: 1, kind: input, shape index: {}]   ;;  %s2072_s2 = inlined_call_operand.vmem [shape: f32[1,256], index: 2, kind: input, shape index: {}]   ;;  %s2073_s3 = inlined_call_operand.hbm [shape: bf16[256,512], index: 3, kind: input, shape index: {}]   ;;  %s2074_s4 = inlined_call_operand.vmem [shape: f32[1,512], index: 4, kind: input, shape index: {}]   ;;  %s2075_s5 = inlined_call_operand.hbm [shape: bf16[2,2,8,128], index: 5, kind: output, shape index: {0}]   ;;  %s2076_s6 = inlined_call_operand.hbm [shape: bf16[2,2,8,128], index: 6, kind: output, shape index: {1}]  }
   0x1   :  { %2081 = sst [smem:[#allocation15_spill]] %s2071_s1 }
   0x2   :  { %2082 = sst [smem:[#allocation16_spill]] %s2073_s3 }
   0x3   :  { %12 = vsyncpa [#allocation3], 0 }
   0x4   :  { %14 = vsyncpa [#allocation3 + $0x1], 0 }
   0x5   :  { %15 = vsyncpa [#allocation6], 0 }
   0x6   :  { %16 = vsyncpa [#allocation4], 0 }
   0x7   :  { %18 = vsyncpa [#allocation4 + $0x1], 0 }
   0x8   :  { %19 = vsyncpa [#allocation10], 0 }
   0x9   :  { %21 = vsyncpa [#allocation10 + $0x1], 0  ;;  %s1819_s21 = smov 0   ;;  %s1821_s22 = smov 0  }
   0xa   :  { %s1823_s23 = smov 0   ;;  %s1825_s24 = smov 0  }
   0xb   :  { %s1827_s25 = smov 0   ;;  %s1829_s26 = smov 0  }
   0xc LB: > { %s1279_s27 = sadd.s32 4294967295, %s1770_s26   ;;  %s1280_s28 = sadd.s32 4294967294, %s1770_s26   ;;  %s1770_s26 = sphi %s1829_s26, %s27_s26   ;;  %s1766_s25 = sphi %s1827_s25, %s2103_s25   ;;  %s1762_s24 = sphi %s1825_s24, %s2102_s24   ;;  %s1758_s23 = sphi %s1823_s23, %s2101_s23   ;;  %s1754_s22 = sphi %s1821_s22, %s2100_s22   ;;  %s1750_s21 = sphi %s1819_s21, %s2099_s21  }
   0xd   : > { %p61_p0 = scmp.ne.s32.totalorder %s1754_s22, %s1750_s21  ;;  %p1853_p1 = scmp.eq.s32.totalorder %s1279_s27, 0 }
   0xe   : > { %p1857_p2 = scmp.eq.s32.totalorder %s1279_s27, 1  ;;  %p177_p3 = scmp.eq.s32.totalorder %s1280_s28, 1 }
   0xf   : > { %s2083_s29 = scalar_select %p1853_p1, 1, 0 }
  0x10   : > { %s2084_s30 = scalar_select %p1857_p2, 1, 0 }
  0x11   : > { %p1863_p4 = por %p1853_p1, %p61_p0  ;;  %p1281_p5 = scmp.ge.s32.totalorder %s1770_s26, 1 }
  0x12   : > { %p1868_p6 = por %p177_p3, %p61_p0  ;;  %p212_p7 = scmp.lt.s32.totalorder %s1770_s26, 3 }
  0x13   : > { %s2085_s7 = scalar_select %p1863_p4, 1, 0 }
  0x14   : > { %s2086_s8 = scalar_select %p1868_p6, 1, 0 }
  0x15   : > { %p1873_p8 = pnand %p1281_p5, %p212_p7  ;;  %s1772_s10 = smov [#allocation5]  }
  0x16   : > { %s225_s11 = sshll.u32 %s1772_s10, 4  ;;  %s1773_s12 = smov [#allocation7]   ;;  %s226_s11 = int_to_ptr.vmem [resolvable:$true] %s225_s11 }
  0x17   : > { %s2087_s9 = scalar_select %p1873_p8, 1, 0 }
  0x18   : > { %p1397_p10 = pneg %p1873_p8  ;;  %s238_s13 = sshll.u32 %s1773_s12, 4  ;;  %s239_s13 = int_to_ptr.vmem [resolvable:$true] %s238_s13 }
  0x19   : > { %s1587_s15 = scalar_lea.vmem %s226_s11, 32  ;;  %p1595_p5 = scmp.lt.s32.totalorder %s226_s11, %s226_s11 }
  0x1a   : > { %p1882_p11 = pnand %p1397_p10, %p1853_p1  ;;  %p1588_p13 = scmp.ne.s32.totalorder %s226_s11, %s1587_s15 }
  0x1b   : > { %p1596_p7 = scmp.lt.s32.totalorder %s1587_s15, %s1587_s15 }
  0x1c   : > { %p1578_p12 = pneg %p1882_p11 }
  0x1d   : > { %p1597_p9 = por %p1596_p7, %p1595_p5 }
  0x1e   : > { %p1590_p0 = pnand %p1588_p13, %p1578_p12 }
  0x20   : > { %p1591_p3 = pneg %p1590_p0 }
  0x22   : > { %p1598_p6 = pnand %p1597_p9, %p1591_p3 }
  0x24   : > { %1601 = shalt.err (!%p1598_p6)
}
  0x25   : > { %s2089_s1 = sld [smem:[#allocation15_spill]]  ;;  %s1613_s18 = scalar_lea.vmem %s239_s13, 8192 }
  0x26   : > { %p1614_p10 = scmp.ne.s32.totalorder %s239_s13, %s1613_s18  ;;  %p1621_p13 = scmp.lt.s32.totalorder %s239_s13, %s239_s13 }
  0x27   : > { %p1622_p0 = scmp.lt.s32.totalorder %s1613_s18, %s1613_s18 }
  0x28   : > { %p1616_p1 = pnand %p1614_p10, %p1578_p12 }
  0x29   : > { %p1623_p8 = por %p1622_p0, %p1621_p13 }
  0x2a   : > { %p1617_p4 = pneg %p1616_p1 }
  0x2b   : > { %1400 = dma.hbm_to_vmem [thread:$0]  (!%p1882_p11), %s2089_s1, 32, %s226_s11, [#allocation6]  }
  0x2c   : > { %p1624_p2 = pnand %p1623_p8, %p1617_p4 }
  0x2e   : > { %1627 = shalt.err (!%p1624_p2)
}
  0x2f   : > { %s1774_s19 = smov 256   ;;  %s1775_s20 = smov 16  }
  0x30   : > { %s2090_s3 = sld [smem:[#allocation16_spill]]  ;;  %s39_s10 = sadd.s32 1, %s1766_s25 }
  0x31   : > { %s48_s11 = sadd.s32 1, %s1758_s23  ;;  %p41_p1 = scmp.ge.s32.totalorder %s39_s10, 2 }
  0x32   : > { %p55_p2 = scmp.ne.s32.totalorder %s1758_s23, %s1754_s22  ;;  %p56_p4 = scmp.eq.s32.totalorder %s1770_s26, 0 }
  0x33   : > { %p1417_p6 = scmp.lt.s32.totalorder %s1770_s26, 2  ;;  %s2105_s10 = smov (%p41_p1, %s39_s10), 0 }
  0x34   : > { %p57_p8 = por %p56_p4, %p55_p2  ;;  %p2091_p9 = scmp.ne.s32.totalorder %s2084_s30, 0 }
  0x35   : > { %s43_s14 = ssub.s32 %s1766_s25, %s2105_s10  ;;  %s255_s15 = sand.u32 1, %s1758_s23  }
  0x36   : > { %1403 = dma.hbm_to_vmem [thread:$0]  (!%p1882_p11), %s2090_s3, 8192, %s239_s13, [#allocation6], %s1774_s19, %s1774_s19, %s1775_s20  }
  0x37   : > { %p1914_p12 = por %p2091_p9, %p55_p2  ;;  %p46_p3 = scmp.eq.s32.totalorder %s43_s14, 0 }
  0x38   : > { %s1285_s13 = sshll.u32 %s255_s15, 4  ;;  %s1370_s16 = sshll.u32 %s1766_s25, 8 }
  0x39   : > { %s1923_s17 = scalar_select %p46_p3, %s1758_s23, %s48_s11  }
  0x3a   : > { %s267_s20 = scalar_lea.hbm %s2070_s0, %s1370_s16  ;;  %s259_s27 = scalar_lea.vmem [#allocation2], %s1285_s13 }
  0x3b   : > { %s269_s28 = sshll.u32 %s259_s27, 4  ;;  %p1930_p11 = pnand %p1417_p6, %p57_p8  ;;  %s270_s28 = int_to_ptr.vmem [resolvable:$true] %s269_s28 }
  0x3c   : > { %s256_s1 = scalar_lea.sflag [#allocation3], %s255_s15  ;;  %s1641_s14 = scalar_lea.vmem %s270_s28, 256 }
  0x3d   : > { %p1630_p5 = pneg %p1930_p11  ;;  %p1642_p7 = scmp.ne.s32.totalorder %s270_s28, %s1641_s14 }
  0x3e   : > { %s1776_s11 = smov [#allocation2]  }
  0x3f   : > { %p1644_p10 = pnand %p1642_p7, %p1630_p5  ;;  %s1646_s3 = sshll.u32 %s1776_s11, 4  ;;  %s1647_s3 = int_to_ptr.vmem [resolvable:$false] %s1646_s3 }
  0x40   : > { %s1648_s16 = scalar_lea.vmem %s1647_s3, 512  ;;  %p1649_p0 = scmp.lt.s32.totalorder %s270_s28, %s1647_s3 }
  0x41   : > { %p1645_p13 = pneg %p1644_p10  ;;  %p1650_p1 = scmp.lt.s32.totalorder %s1648_s16, %s1641_s14 }
  0x43   : > { %p1651_p2 = por %p1650_p1, %p1649_p0 }
  0x45   : > { %p1652_p4 = pnand %p1651_p2, %p1645_p13 }
  0x47   : > { %1655 = shalt.err (!%p1652_p4)
}
  0x48   : > { %1407 = dma.hbm_to_vmem [thread:$0]  (!%p1930_p11), %s267_s20, 256, %s270_s28, %s256_s1  }
  0x49   : > { %p2094_p6 = scmp.ne.s32.totalorder %s2087_s9, 0 }
  0x4a   : > { %s1941_s15 = sand.u32 (!%p2094_p6), 1, %s1754_s22   ;;  %p2095_p8 = scmp.ne.s32.totalorder (!%p2094_p6), %s2085_s7, 0 }
  0x4b   : > { %278 = sbr.rel (%p2094_p6) target bundleno = 651 (0x28b), region = 40  ;;  %s1289_s13 = sshll.u32 (!%p2094_p6), %s1941_s15, 4 }
  0x4c   : > { %s281_s18 = scalar_lea.sflag (!%p2094_p6), [#allocation3], %s1941_s15  ;;  %s284_s19 = scalar_lea.vmem (!%p2094_p6), [#allocation2], %s1289_s13 }
  0x50   : > { %1733 = dma.done.wait (%p2095_p8), %s281_s18, 256  }
  0x51   : > { %1735 = vsyncadd (%p2095_p8), %s281_s18, 4294967040  ;;  %p2096_p9 = scmp.ne.s32.totalorder %s2083_s29, 0 }
  0x53   : > { %1737 = dma.done.wait (%p2096_p9), [#allocation6], 8224  }
  0x54   : > { %1739 = vsyncadd (%p2096_p9), [#allocation6], 4294959072  ;;  %v1953_v0 = vld [vmem:[%s284_s19] sm:$0xff]  ;;  %v1955_v1 = vld [vmem:[%s284_s19 + $0x8] sm:$0xff]  ;;  %s1292_s9 = sshll.u32 %s1941_s15, 3  ;;  %s1371_s20 = sshll.u32 %s1762_s24, 7 }
  0x55   : > { %v330_v2 = vadd.f32 %v1955_v1, %v1953_v0  ;;  %v1478_v3 = vld [vmem:[#allocation7 + $0xe4] ss:$16 sps:$4 sm:$0xff]   ;;  %v1480_v4 = vld [vmem:[#allocation7 + $0xec] ss:$16 sps:$4 sm:$0xff]   ;;  %v1482_v5 = vld [vmem:[#allocation7 + $0xe0] ss:$16 sps:$4 sm:$0xff]   ;;  %s1982_s11 = scalar_lea.hbm %s2075_s5, %s1371_s20  ;;  %s1992_s19 = scalar_lea.hbm %s2076_s6, %s1371_s20 }
  0x56   : > { %v1483_v6 = vld [vmem:[#allocation7 + $0xe8] ss:$16 sps:$4 sm:$0xff]   ;;  %v1484_v7 = vld [vmem:[#allocation7 + $0xc4] ss:$16 sps:$4 sm:$0xff]   ;;  %v1486_v8 = vld [vmem:[#allocation7 + $0xcc] ss:$16 sps:$4 sm:$0xff]   ;;  %781 = vmatprep.subr.bf16.mxu0 %v1478_v3  ;;  %822 = vmatprep.subr.bf16.mxu1 %v1480_v4 }
  0x57   : > { %331 = vadd.xlane.f32.xlu0 %v330_v2  ;;  %782 = vmatpush1.bf16.msra.mxu0 %v1482_v5  ;;  %v1488_v9 = vld [vmem:[#allocation7 + $0xc0] ss:$16 sps:$4 sm:$0xff]   ;;  %v1489_v10 = vld [vmem:[#allocation7 + $0xc8] ss:$16 sps:$4 sm:$0xff]   ;;  %v1490_v11 = vld [vmem:[#allocation7 + $0xa4] ss:$16 sps:$4 sm:$0xff]  }
  0x58   : > { %823 = vmatpush1.bf16.msra.mxu1 %v1483_v6  ;;  %783 = vmatprep.subr.bf16.mxu0 %v1484_v7  ;;  %v1492_v12 = vld [vmem:[#allocation7 + $0xac] ss:$16 sps:$4 sm:$0xff]   ;;  %v1494_v13 = vld [vmem:[#allocation7 + $0xa0] ss:$16 sps:$4 sm:$0xff]   ;;  %v1495_v14 = vld [vmem:[#allocation7 + $0xa8] ss:$16 sps:$4 sm:$0xff]  }
  0x59   : > { %824 = vmatprep.subr.bf16.mxu1 %v1486_v8  ;;  %v1496_v15 = vld [vmem:[#allocation7 + $0x84] ss:$16 sps:$4 sm:$0xff]   ;;  %v1498_v16 = vld [vmem:[#allocation7 + $0x8c] ss:$16 sps:$4 sm:$0xff]   ;;  %v1500_v17 = vld [vmem:[#allocation7 + $0x80] ss:$16 sps:$4 sm:$0xff]  }
  0x5a   : > { %v1501_v18 = vld [vmem:[#allocation7 + $0x88] ss:$16 sps:$4 sm:$0xff]   ;;  %v1502_v19 = vld [vmem:[#allocation7 + $0x64] ss:$16 sps:$4 sm:$0xff]   ;;  %v1504_v20 = vld [vmem:[#allocation7 + $0x6c] ss:$16 sps:$4 sm:$0xff]  }
  0x5b   : > { %784 = vmatpush1.bf16.msra.mxu0 %v1488_v9  ;;  %v1506_v21 = vld [vmem:[#allocation7 + $0x60] ss:$16 sps:$4 sm:$0xff]   ;;  %v1507_v22 = vld [vmem:[#allocation7 + $0x68] ss:$16 sps:$4 sm:$0xff]   ;;  %v1508_v23 = vld [vmem:[#allocation7 + $0x44] ss:$16 sps:$4 sm:$0xff]  }
  0x5c   : > { %825 = vmatpush1.bf16.msra.mxu1 %v1489_v10  ;;  %785 = vmatprep.subr.bf16.mxu0 %v1490_v11  ;;  %v1510_v24 = vld [vmem:[#allocation7 + $0x4c] ss:$16 sps:$4 sm:$0xff]   ;;  %v1512_v25 = vld [vmem:[#allocation7 + $0x40] ss:$16 sps:$4 sm:$0xff]   ;;  %v1513_v26 = vld [vmem:[#allocation7 + $0x48] ss:$16 sps:$4 sm:$0xff]  }
  0x5d   : > { %826 = vmatprep.subr.bf16.mxu1 %v1492_v12  ;;  %v1514_v27 = vld [vmem:[#allocation7 + $0x24] ss:$16 sps:$4 sm:$0xff]   ;;  %v1516_v28 = vld [vmem:[#allocation7 + $0x2c] ss:$16 sps:$4 sm:$0xff]   ;;  %v1518_v29 = vld [vmem:[#allocation7 + $0x20] ss:$16 sps:$4 sm:$0xff]  }
  0x5e   : > { %v1519_v30 = vld [vmem:[#allocation7 + $0x28] ss:$16 sps:$4 sm:$0xff]   ;;  %v1520_v31 = vld [vmem:[#allocation7 + $0x4] ss:$16 sps:$4 sm:$0xff]   ;;  %v1522_v32 = vld [vmem:[#allocation7 + $0xc] ss:$16 sps:$4 sm:$0xff]  }
  0x5f   : > { %786 = vmatpush1.bf16.msra.mxu0 %v1494_v13  ;;  %v1524_v33 = vld [vmem:[#allocation7] ss:$16 sps:$4 sm:$0xff]   ;;  %v1525_v34 = vld [vmem:[#allocation7 + $0x8] ss:$16 sps:$4 sm:$0xff]   ;;  %v1526_v35 = vld [vmem:[#allocation7 + $0x1e4] ss:$16 sps:$4 sm:$0xff]   ;;  %v348_v13 = vlaneseq }
  0x60   : > { %827 = vmatpush1.bf16.msra.mxu1 %v1495_v14  ;;  %787 = vmatprep.subr.bf16.mxu0 %v1496_v15  ;;  %v1528_v36 = vld [vmem:[#allocation7 + $0x1ec] ss:$16 sps:$4 sm:$0xff]   ;;  %v1530_v37 = vld [vmem:[#allocation7 + $0x1e0] ss:$16 sps:$4 sm:$0xff]   ;;  %v1531_v38 = vld [vmem:[#allocation7 + $0x1e8] ss:$16 sps:$4 sm:$0xff]  }
  0x61   : > { %828 = vmatprep.subr.bf16.mxu1 %v1498_v16  ;;  %v1532_v39 = vld [vmem:[#allocation7 + $0x1c4] ss:$16 sps:$4 sm:$0xff]   ;;  %v1534_v40 = vld [vmem:[#allocation7 + $0x1cc] ss:$16 sps:$4 sm:$0xff]   ;;  %v1536_v48 = vld [vmem:[#allocation7 + $0x1c0] ss:$16 sps:$4 sm:$0xff]  }
  0x62   : > { %v1537_v49 = vld [vmem:[#allocation7 + $0x1c8] ss:$16 sps:$4 sm:$0xff]   ;;  %v1538_v50 = vld [vmem:[#allocation7 + $0x1a4] ss:$16 sps:$4 sm:$0xff]   ;;  %v1540_v51 = vld [vmem:[#allocation7 + $0x1ac] ss:$16 sps:$4 sm:$0xff]  }
  0x63   : > { %788 = vmatpush1.bf16.msra.mxu0 %v1500_v17  ;;  %v1542_v52 = vld [vmem:[#allocation7 + $0x1a0] ss:$16 sps:$4 sm:$0xff]   ;;  %v1543_v53 = vld [vmem:[#allocation7 + $0x1a8] ss:$16 sps:$4 sm:$0xff]   ;;  %v1544_v54 = vld [vmem:[#allocation7 + $0x184] ss:$16 sps:$4 sm:$0xff]  }
  0x64   : > { %829 = vmatpush1.bf16.msra.mxu1 %v1501_v18  ;;  %789 = vmatprep.subr.bf16.mxu0 %v1502_v19  ;;  %v1546_v55 = vld [vmem:[#allocation7 + $0x18c] ss:$16 sps:$4 sm:$0xff]   ;;  %v1548_v56 = vld [vmem:[#allocation7 + $0x180] ss:$16 sps:$4 sm:$0xff]   ;;  %v1549_v57 = vld [vmem:[#allocation7 + $0x188] ss:$16 sps:$4 sm:$0xff]  }
  0x65   : > { %830 = vmatprep.subr.bf16.mxu1 %v1504_v20  ;;  %v1550_v58 = vld [vmem:[#allocation7 + $0x164] ss:$16 sps:$4 sm:$0xff]   ;;  %v1552_v59 = vld [vmem:[#allocation7 + $0x16c] ss:$16 sps:$4 sm:$0xff]   ;;  %v1554_v60 = vld [vmem:[#allocation7 + $0x160] ss:$16 sps:$4 sm:$0xff]  }
  0x66   : > { %v1555_v61 = vld [vmem:[#allocation7 + $0x168] ss:$16 sps:$4 sm:$0xff]   ;;  %v1556_v62 = vld [vmem:[#allocation7 + $0x144] ss:$16 sps:$4 sm:$0xff]   ;;  %v1558_v63 = vld [vmem:[#allocation7 + $0x14c] ss:$16 sps:$4 sm:$0xff]  }
  0x67   : > { %790 = vmatpush1.bf16.msra.mxu0 %v1506_v21  ;;  %v1562_v2 = vld [vmem:[#allocation7 + $0x124] ss:$16 sps:$4 sm:$0xff]   ;;  %v1564_v3 = vld [vmem:[#allocation7 + $0x12c] ss:$16 sps:$4 sm:$0xff]   ;;  %v1566_v4 = vld [vmem:[#allocation7 + $0x120] ss:$16 sps:$4 sm:$0xff]  }
  0x68   : > { %831 = vmatpush1.bf16.msra.mxu1 %v1507_v22  ;;  %791 = vmatprep.subr.bf16.mxu0 %v1508_v23  ;;  %v1567_v5 = vld [vmem:[#allocation7 + $0x128] ss:$16 sps:$4 sm:$0xff]   ;;  %v1568_v6 = vld [vmem:[#allocation7 + $0x104] ss:$16 sps:$4 sm:$0xff]   ;;  %v1570_v7 = vld [vmem:[#allocation7 + $0x10c] ss:$16 sps:$4 sm:$0xff]  }
  0x69   : > { %832 = vmatprep.subr.bf16.mxu1 %v1510_v24  ;;  %v1572_v8 = vld [vmem:[#allocation7 + $0x100] ss:$16 sps:$4 sm:$0xff]   ;;  %v1573_v9 = vld [vmem:[#allocation7 + $0x108] ss:$16 sps:$4 sm:$0xff]   ;;  %v349_v14 = vshrl.u32 %v348_v13, 7  ;;  %s318_s27 = scalar_lea.vmem [#allocation8], %s1292_s9 }
  0x6a   : > { %v328_v17 = vld [vmem:[#allocation5] sm:$0x3]  ;;  %s1123_s28 = sshll.u32 %s318_s27, 4  ;;  %s1984_s16 = scalar_lea.vmem [#allocation9], %s1292_s9  ;;  %s1987_s28 = int_to_ptr.vmem [resolvable:$true] %s1123_s28 }
  0x6b   : > { %792 = vmatpush1.bf16.msra.mxu0 %v1512_v25  ;;  %v350_v15 = vsub.s32 0, %v349_v14  ;;  %v354_v16 = vsub.s32 1, %v349_v14  ;;  %v329_v18 = vld [vmem:[%s2072_s2] sm:$0x3]  ;;  %s1140_s13 = sshll.u32 %s1984_s16, 4  ;;  %s1104_s1 = scalar_lea.sflag [#allocation4], %s1941_s15  ;;  %s1994_s13 = int_to_ptr.vmem [resolvable:$true] %s1140_s13 }
  0x6c   : > { %833 = vmatpush1.bf16.msra.mxu1 %v1513_v26  ;;  %793 = vmatprep.subr.bf16.mxu0 %v1514_v27  ;;  %s1656_s3 = scalar_lea.vmem %s1987_s28, 128  ;;  %s1780_s29 = smov [#allocation8]  }
  0x6d   : > { %834 = vmatprep.subr.bf16.mxu1 %v1516_v28  ;;  %v351_v19 = vrot.slane %v328_v17, %v350_v15  ;;  %v355_v20 = vrot.slane %v328_v17, %v354_v16  ;;  %v364_v23 = vrot.slane %v329_v18, %v350_v15  ;;  %v368_v24 = vrot.slane %v329_v18, %v354_v16  ;;  %p1657_p3 = scmp.ne.s32.totalorder %s1987_s28, %s1656_s3  ;;  %s1660_s7 = sshll.u32 %s1780_s29, 4  ;;  %s1661_s7 = int_to_ptr.vmem [resolvable:$false] %s1660_s7 }
  0x6e   : > { %s1662_s9 = scalar_lea.vmem %s1661_s7, 256  ;;  %p1663_p7 = scmp.lt.s32.totalorder %s1987_s28, %s1661_s7 }
  0x6f   : > { %794 = vmatpush1.bf16.msra.mxu0 %v1518_v29  ;;  %p1658_p11 = pnand %p1657_p3, %p1914_p12  ;;  %p1664_p10 = scmp.lt.s32.totalorder %s1662_s9, %s1656_s3 }
  0x70   : > { %835 = vmatpush1.bf16.msra.mxu1 %v1519_v30  ;;  %795 = vmatprep.subr.bf16.mxu0 %v1520_v31 }
  0x71   : > { %836 = vmatprep.subr.bf16.mxu1 %v1522_v32  ;;  %v1777_v32 = vmov 1983009808   ;;  %p1659_p5 = pneg %p1658_p11  ;;  %p1665_p13 = por %p1664_p10, %p1663_p7 }
  0x73   : > { %796 = vmatpush1.bf16.msra.mxu0 %v1524_v33  ;;  %v865_v33 = vunpack.c.l.s4 %v1777_v32  ;;  %p1666_p0 = pnand %p1665_p13, %p1659_p5 }
  0x74   : > { %837 = vmatpush1.bf16.msra.mxu1 %v1525_v34  ;;  %797 = vmatprep.subr.bf16.mxu0 %v1526_v35  ;;  %v451_v34 = vsub.s32 2, %v349_v14  ;;  %v439_v35 = vld [vmem:[%s2074_s4] sm:$0xf] }
  0x75   : > { %838 = vmatprep.subr.bf16.mxu1 %v1528_v36  ;;  %v455_v36 = vsub.s32 3, %v349_v14 }
  0x77   : > { %798 = vmatpush2.bf16.msra.mxu0 %v1530_v37  ;;  %v866_v37 = vunpack.c.0.s8 %v865_v33 }
  0x78   : > { %839 = vmatpush2.bf16.msra.mxu1 %v1531_v38  ;;  %799 = vmatprep.subr.bf16.mxu0 %v1532_v39  ;;  %v1778_v38 = vmov 1934713408  }
  0x79   : > { %840 = vmatprep.subr.bf16.mxu1 %v1534_v40  ;;  %v896_v39 = vunpack.c.l.s4 %v1778_v38  ;;  %v444_v40 = vrot.slane %v439_v35, %v350_v15 }
  0x7b   : > { %800 = vmatpush2.bf16.msra.mxu0 %v1536_v48 }
  0x7c   : > { %841 = vmatpush2.bf16.msra.mxu1 %v1537_v49  ;;  %801 = vmatprep.subr.bf16.mxu0 %v1538_v50 }
  0x7d   : > { %842 = vmatprep.subr.bf16.mxu1 %v1540_v51 }
  0x7f   : > { %802 = vmatpush2.bf16.msra.mxu0 %v1542_v52  ;;  %v1779_v52 = vmov 0.0  }
  0x80   : > { %843 = vmatpush2.bf16.msra.mxu1 %v1543_v53  ;;  %803 = vmatprep.subr.bf16.mxu0 %v1544_v54 }
  0x81   : > { %844 = vmatprep.subr.bf16.mxu1 %v1546_v55 }
  0x83   : > { %804 = vmatpush2.bf16.msra.mxu0 %v1548_v56 }
  0x84   : > { %845 = vmatpush2.bf16.msra.mxu1 %v1549_v57  ;;  %805 = vmatprep.subr.bf16.mxu0 %v1550_v58 }
  0x85   : > { %846 = vmatprep.subr.bf16.mxu1 %v1552_v59 }
  0x87   : > { %806 = vmatpush2.bf16.msra.mxu0 %v1554_v60 }
  0x88   : > { %847 = vmatpush2.bf16.msra.mxu1 %v1555_v61  ;;  %807 = vmatprep.subr.bf16.mxu0 %v1556_v62 }
  0x89   : > { %848 = vmatprep.subr.bf16.mxu1 %v1558_v63 }
  0xe0   : > { %v332_v41 = vpop.xlane.xlu0 %331 }
  0xe1   : > { %v334_v42 = vmul.f32 0.00390625, %v332_v41  ;;  %v452_v41 = vrot.slane %v439_v35, %v451_v34 }
  0xe3   : > { %v1960_v43 = vsub.f32 %v1953_v0, %v334_v42  ;;  %v1963_v44 = vsub.f32 %v1955_v1, %v334_v42  ;;  %v1560_v0 = vld [vmem:[#allocation7 + $0x140] ss:$16 sps:$4 sm:$0xff]   ;;  %v1561_v1 = vld [vmem:[#allocation7 + $0x148] ss:$16 sps:$4 sm:$0xff]  }
  0xe4   : > { %808 = vmatpush2.bf16.msra.mxu0 %v1560_v0  ;;  %849 = vmatpush2.bf16.msra.mxu1 %v1561_v1 }
  0xe5   : > { %v337_v45 = vmul.f32 %v1960_v43, %v1960_v43  ;;  %v338_v46 = vmul.f32 %v1963_v44, %v1963_v44  ;;  %809 = vmatprep.subr.bf16.mxu0 %v1562_v2  ;;  %850 = vmatprep.subr.bf16.mxu1 %v1564_v3 }
  0xe7   : > { %v339_v47 = vadd.f32 %v338_v46, %v337_v45  ;;  %v456_v45 = vrot.slane %v439_v35, %v455_v36  ;;  %v869_v46 = vsub.s32 %v866_v37, %v349_v14 }
  0xe8   : > { %810 = vmatpush2.bf16.msra.mxu0 %v1566_v4  ;;  %851 = vmatpush2.bf16.msra.mxu1 %v1567_v5 }
  0xe9   : > { %340 = vadd.xlane.f32.xlu0 %v339_v47  ;;  %811 = vmatprep.subr.bf16.mxu0 %v1568_v6  ;;  %v897_v47 = vunpack.c.0.s8 %v896_v39 }
  0xea   : > { %852 = vmatprep.subr.bf16.mxu1 %v1570_v7 }
  0xeb   : > { %v900_v58 = vsub.s32 %v897_v47, %v349_v14 }
  0xec   : > { %812 = vmatpush2.bf16.msra.mxu0 %v1572_v8  ;;  %853 = vmatpush2.bf16.msra.mxu1 %v1573_v9 }
 0x172   : > { %v341_v10 = vpop.xlane.xlu0 %340 }
 0x173   : > { %v342_v11 = vmul.f32 0.00390625, %v341_v10 }
 0x175   : > { %v343_v12 = vadd.f32 1e-05, %v342_v11 }
 0x177   : > { %1574 = vrsqrt.f32 %v343_v12 }
 0x184   : > { %v1575_v21 = vpop.eup %1574 }
 0x185   : > { %v346_v22 = vmul.f32 %v1575_v21, %v1963_v44  ;;  %v345_v25 = vmul.f32 %v1575_v21, %v1960_v43  ;;  %v448_v44 = vrot.slane %v439_v35, %v354_v16 }
 0x187   : > { %v359_v26 = vmul.f32 %v355_v20, %v346_v22  ;;  %v358_v27 = vmul.f32 %v351_v19, %v345_v25 }
 0x189   : > { %v372_v28 = vadd.f32 %v368_v24, %v359_v26  ;;  %v371_v29 = vadd.f32 %v364_v23, %v358_v27 }
 0x18b   : > { %v374_v30 = vpack.c.bf16 %v372_v28, %v372_v28  ;;  %v373_v31 = vpack.c.bf16 %v371_v29, %v371_v29 }
 0x18d   : > { %813 = vmatprep.mubr.bf16.mxu0 %v374_v30  ;;  %854 = vmatprep.mubr.bf16.mxu1 %v374_v30 }
 0x18e   : > { %814 = vmatmul.mubr.bf16.vlgmr.msra.gmra.mxu0 %v373_v31  ;;  %855 = vmatmul.mubr.bf16.vlgmr.msra.gmra.mxu1 %v373_v31 }
 0x24e   : > { %v815_v42 = vpop.f32.mrf.mxu0  ;;  %v856_v43 = vpop.f32.mrf.mxu1 }
 0x24f   : > { %v816_v48 = vadd.f32 %v815_v42, %v444_v40  ;;  %v857_v49 = vadd.f32 %v856_v43, %v452_v41 }
 0x250   : > { %v817_v50 = vpop.f32.mrf.mxu0  ;;  %v858_v51 = vpop.f32.mrf.mxu1 }
 0x251   : > { %v863_v53 = vcombine.high %v816_v48, %v1779_v52  ;;  %v818_v54 = vadd.f32 %v817_v50, %v448_v44  ;;  %v859_v55 = vadd.f32 %v858_v51, %v456_v45  ;;  %v870_v59 = vrot.slane %v816_v48, %v869_v46 }
 0x252   : > { %v819_v56 = vpop.f32.mrf.mxu0  ;;  %v860_v57 = vpop.f32.mrf.mxu1  ;;  %v983_v60 = vcombine.high %v857_v49, %v1779_v52  ;;  %v990_v4 = vrot.slane %v857_v49, %v869_v46 }
 0x253   : > { %v878_v61 = vcombine.high %v818_v54, %v1779_v52  ;;  %v885_v62 = vrot.slane %v818_v54, %v869_v46  ;;  %v998_v63 = vcombine.high %v859_v55, %v1779_v52  ;;  %v1005_v0 = vrot.slane %v859_v55, %v869_v46 }
 0x254   : > { %v820_v1 = vpop.f32.mrf.mxu0  ;;  %v861_v2 = vpop.f32.mrf.mxu1  ;;  %v877_v3 = vrot.slane %v863_v53, %v869_v46  ;;  %v997_v9 = vrot.slane %v983_v60, %v869_v46 }
 0x255   : > { %v892_v5 = vrot.slane %v878_v61, %v869_v46  ;;  %v893_v6 = vcombine.low %v870_v59, %v885_v62  ;;  %v894_v7 = vcombine.high %v870_v59, %v885_v62  ;;  %v1012_v8 = vrot.slane %v998_v63, %v869_v46 }
 0x256   : > { %v1013_v10 = vcombine.low %v990_v4, %v1005_v0  ;;  %v1014_v11 = vcombine.high %v990_v4, %v1005_v0 }
 0x257   : > { %v901_v12 = vrot.slane %v893_v6, %v900_v58  ;;  %v908_v13 = vrot.slane %v894_v7, %v900_v58  ;;  %v909_v14 = vcombine.low %v877_v3, %v892_v5  ;;  %v910_v15 = vcombine.high %v877_v3, %v892_v5 }
 0x258   : > { %v1021_v16 = vrot.slane %v1013_v10, %v900_v58  ;;  %v1028_v17 = vrot.slane %v1014_v11, %v900_v58  ;;  %v1029_v18 = vcombine.low %v997_v9, %v1012_v8  ;;  %v1030_v19 = vcombine.high %v997_v9, %v1012_v8 }
 0x259   : > { %v917_v20 = vrot.slane %v909_v14, %v900_v58  ;;  %v924_v21 = vrot.slane %v910_v15, %v900_v58  ;;  %v929_v22 = vcombine.low %v901_v12, %v908_v13  ;;  %v1358_v23 = vcombine.high %v901_v12, %v908_v13 }
 0x25a   : > { %v1037_v24 = vrot.slane %v1029_v18, %v900_v58  ;;  %v1044_v25 = vrot.slane %v1030_v19, %v900_v58  ;;  %v1049_v26 = vcombine.low %v1021_v16, %v1028_v17  ;;  %v1360_v27 = vcombine.high %v1021_v16, %v1028_v17 }
 0x25b   : > { %v936_v28 = vrot.slane %v929_v22, %v869_v46  ;;  %v944_v29 = vrot.slane %v1358_v23, %v869_v46  ;;  %v945_v30 = vcombine.low %v917_v20, %v924_v21  ;;  %v1359_v31 = vcombine.high %v917_v20, %v924_v21 }
 0x25c   : > { %v1056_v32 = vrot.slane %v1049_v26, %v869_v46  ;;  %v1064_v33 = vrot.slane %v1360_v27, %v869_v46  ;;  %v1065_v34 = vcombine.low %v1037_v24, %v1044_v25  ;;  %v1361_v35 = vcombine.high %v1037_v24, %v1044_v25 }
 0x25d   : > { %v952_v36 = vrot.slane %v945_v30, %v869_v46  ;;  %v960_v37 = vrot.slane %v1359_v31, %v869_v46  ;;  %v961_v38 = vcombine.low %v936_v28, %v944_v29 }
 0x25e   : > { %v1072_v39 = vrot.slane %v1065_v34, %v869_v46  ;;  %v1080_v40 = vrot.slane %v1361_v35, %v869_v46  ;;  %v1081_v41 = vcombine.low %v1056_v32, %v1064_v33 }
 0x25f   : > { %v969_v42 = vcombine.low %v952_v36, %v960_v37  ;;  %v968_v44 = vrot.slane %v961_v38, %v900_v58 }
 0x260   : > { %v1089_v43 = vcombine.low %v1072_v39, %v1080_v40  ;;  %v1088_v47 = vrot.slane %v1081_v41, %v900_v58 }
 0x261   : > { %v976_v45 = vrot.slane %v969_v42, %v900_v58 }
 0x262   : > { %v1096_v48 = vrot.slane %v1089_v43, %v900_v58 }
 0x263   : > { %v977_v49 = vcombine.low %v968_v44, %v976_v45  ;;  %v978_v50 = vcombine.high %v968_v44, %v976_v45 }
 0x264   : > { %v1097_v46 = vcombine.low %v1088_v47, %v1096_v48  ;;  %v1098_v51 = vcombine.high %v1088_v47, %v1096_v48 }
 0x265   : > { %v1376_v52 = vpack.c.bf16 %v978_v50, %v977_v49 }
 0x266   : > { %v1381_v53 = vpack.c.bf16 %v1098_v51, %v1097_v46 }
 0x267   : > { %1377 = vst [vmem:[%s318_s27] sm:$0xff] %v1376_v52  }
 0x268   : > { %1669 = shalt.err (!%p1666_p0)
}
 0x269   : > { %s1670_s20 = scalar_lea.hbm %s1982_s11, 128  ;;  %s1674_s14 = scalar_lea.hbm %s2075_s5, 256 }
 0x26a   : > { %p1671_p1 = scmp.ne.s32.totalorder %s1982_s11, %s1670_s20  ;;  %p1675_p6 = scmp.lt.s32.totalorder %s1982_s11, %s2075_s5 }
 0x26b   : > { %p1676_p8 = scmp.lt.s32.totalorder %s1674_s14, %s1670_s20 }
 0x26c   : > { %p1672_p2 = pnand %p1671_p1, %p1914_p12 }
 0x26d   : > { %p1677_p9 = por %p1676_p8, %p1675_p6 }
 0x26e   : > { %p1673_p4 = pneg %p1672_p2 }
 0x270   : > { %p1678_p3 = pnand %p1677_p9, %p1673_p4 }
 0x272   : > { %1681 = shalt.err (!%p1678_p3)
}
 0x273   : > { %s1781_s3 = smov 64   ;;  %s1782_s29 = smov 4   ;;  %1382 = vst [vmem:[%s1984_s16] sm:$0xff] %v1381_v53  }
 0x274   : > { %1393 = dma.vmem_to_hbm [thread:$0]  (%p1914_p12), %s1987_s28, 128, %s1982_s11, %s1104_s1, %s1781_s3, %s1781_s3, %s1782_s29  }
 0x275   : > { %s1109_s7 = scalar_lea.sflag [#allocation10], %s1941_s15  ;;  %s1682_s9 = scalar_lea.vmem %s1994_s13, 128 }
 0x276   : > { %p1683_p11 = scmp.ne.s32.totalorder %s1994_s13, %s1682_s9  ;;  %s1783_s20 = smov [#allocation9]  }
 0x277   : > { %s1686_s27 = sshll.u32 %s1783_s20, 4  ;;  %s1687_s27 = int_to_ptr.vmem [resolvable:$false] %s1686_s27 }
 0x278   : > { %p1684_p5 = pnand %p1683_p11, %p1914_p12  ;;  %s1688_s30 = scalar_lea.vmem %s1687_s27, 256 }
 0x279   : > { %p1689_p10 = scmp.lt.s32.totalorder %s1994_s13, %s1687_s27  ;;  %p1690_p13 = scmp.lt.s32.totalorder %s1688_s30, %s1682_s9 }
 0x27a   : > { %p1685_p7 = pneg %p1684_p5 }
 0x27b   : > { %p1691_p0 = por %p1690_p13, %p1689_p10 }
 0x27d   : > { %p1692_p1 = pnand %p1691_p0, %p1685_p7 }
 0x27f   : > { %1695 = shalt.err (!%p1692_p1)
}
 0x280   : > { %s1696_s28 = scalar_lea.hbm %s1992_s19, 128  ;;  %s1700_s16 = scalar_lea.hbm %s2076_s6, 256 }
 0x281   : > { %p1697_p2 = scmp.ne.s32.totalorder %s1992_s19, %s1696_s28  ;;  %p1701_p8 = scmp.lt.s32.totalorder %s1992_s19, %s2076_s6 }
 0x282   : > { %p1702_p9 = scmp.lt.s32.totalorder %s1700_s16, %s1696_s28 }
 0x283   : > { %p1698_p4 = pnand %p1697_p2, %p1914_p12 }
 0x284   : > { %p1703_p3 = por %p1702_p9, %p1701_p8 }
 0x285   : > { %p1699_p6 = pneg %p1698_p4 }
 0x287   : > { %p1704_p11 = pnand %p1703_p3, %p1699_p6 }
 0x289   : > { %1707 = shalt.err (!%p1704_p11)
}
 0x28a   : > { %1394 = dma.vmem_to_hbm [thread:$0]  (%p1914_p12), %s1994_s13, 128, %s1992_s19, %s1109_s7, %s1781_s3, %s1781_s3, %s1782_s29  }
 0x28b PF: > { %s1155_s24 = sand.u32 1, %s1750_s21   ;;  %p2097_p5 = scmp.ne.s32.totalorder %s2086_s8, 0 }
 0x28c   : > { %p2098_p7 = scmp.ge.s32.totalorder %s1770_s26, 2  ;;  %s1156_s18 = scalar_lea.sflag [#allocation4], %s1155_s24 }
 0x28e   : > { %p1409_p10 = pnand %p2098_p7, %p2097_p5 }
 0x290   : > { %p1410_p13 = pneg %p1409_p10 }
 0x292   : > { %1741 = dma.done.wait (%p1410_p13), %s1156_s18, 128  }
 0x293   : > { %1743 = vsyncadd (%p1410_p13), %s1156_s18, 4294967168  ;;  %s1165_s9 = scalar_lea.sflag [#allocation10], %s1155_s24 }
 0x294   : > { %1745 = dma.done.wait (%p1410_p13), %s1165_s9, 128  }
 0x295   : > { %1747 = vsyncadd (%p1410_p13), %s1165_s9, 4294967168  ;;  %s27_s26 = sadd.s32 1, %s1770_s26   ;;  %s2099_s21 = smov %s1754_s22 }
 0x296   : > { %p24_p0 = scmp.ge.s32.totalorder %s27_s26, 4   ;;  %s2100_s22 = smov %s1758_s23 }
 0x297   : > { %s2101_s23 = smov %s1923_s17  ;;  %s2102_s24 = smov %s1766_s25 }
 0x298   : > { %s2103_s25 = smov %s2105_s10  ;;  %26 = sbr.rel (!%p24_p0) target bundleno = 12 (0xc), region = 110 }
 0x29d   :  { %1170 = vsyncpa [#allocation3], 1 }
 0x29e   :  { %1172 = vsyncpa [#allocation3 + $0x1], 1 }
 0x29f   :  { %1173 = vsyncpa [#allocation6], 1 }
 0x2a0   :  { %1174 = vsyncpa [#allocation4], 1 }
 0x2a1   :  { %1176 = vsyncpa [#allocation4 + $0x1], 1 }
 0x2a2   :  { %1177 = vsyncpa [#allocation10], 1 }
 0x2a3   :  { %1179 = vsyncpa [#allocation10 + $0x1], 1 }

</bundles_post_ra>
